<compile_context>
chip_gen: v7x
topology: tpu7x:2x2x1
jax: 0.10.0
libtpu: 0.0.40
codegen_flags: <defaults>
</compile_context>

<pallas_src>
import functools

import jax
import jax.numpy as jnp
from jax import lax
from jax.experimental import pallas as pl
from jax.experimental.pallas import tpu as pltpu

LANE = 128
SUBLANE = 8


def _round_up(x: int, m: int) -> int:
    return ((x + m - 1) // m) * m


def fc_conv_kernel(x_ref, w1_ref, shift_ref, w2_ref, b2_ref, out_ref, *, precision):
    # Hidden ConvLayer (1x1 conv, no bias) with the BN scale pre-folded into
    # w1: a channel-axis matmul on the MXU with f32 accumulation.
    h = jnp.dot(x_ref[...], w1_ref[...],
                preferred_element_type=jnp.float32, precision=precision)
    # BatchNorm (eval) shift + ReLU (VPU).  Shift/bias stay f32 for accuracy.
    h = jnp.maximum(h + shift_ref[...], 0.0)
    # TODO(synk): Dropout is inference-mode identity (no RNG / masking here).
    # Final ConvLayer: 1x1 conv with bias, no norm/act.  Output block is
    # compact (num_classes wide), so nothing lane-padded round-trips to HBM.
    y = jnp.dot(h, w2_ref[...].astype(jnp.float32),
                preferred_element_type=jnp.float32, precision=precision)
    out_ref[...] = (y + b2_ref[...]).astype(out_ref.dtype)


@functools.partial(
    jax.jit, static_argnames=("block_m", "compute_dtype", "min_pallas_batch"))
def fc_conv(x, w1, bn_scale, bn_shift, w2, b2, *,
            block_m=1024, compute_dtype=None, min_pallas_batch=256):
    """x: (B, Cin); w1: (Cin, H); bn_scale/bn_shift: (1, H); w2: (H, N); b2: (1, N)."""
    B, cin = x.shape
    hidden = w1.shape[1]
    num_classes = w2.shape[1]

    cdt = jnp.dtype(compute_dtype) if compute_dtype is not None else x.dtype

    # Small-batch fallback: for tiny B the pallas_call launch overhead dwarfs
    # the ~microsecond of work; XLA's fused matmul is faster on every gen.
    if B < min_pallas_batch:
        h = jnp.maximum(x @ (w1 * bn_scale) + bn_shift, 0.0)
        return (h @ w2 + b2).astype(cdt)

    # f32 inputs: exact MXU passes (compute is negligible, kernel is HBM-bound);
    # bf16 inputs: native single-pass bf16.
    precision = (lax.Precision.HIGHEST if cdt == jnp.dtype(jnp.float32)
                 else lax.Precision.DEFAULT)

    # Fold BN scale into the hidden conv weight (tiny, trace-time) and cast the
    # matmul operands to the compute dtype.  Shift/bias stay f32: they are
    # added to the f32 accumulator inside the kernel.
    w1f = (w1 * bn_scale).astype(cdt)
    w2c = w2.astype(cdt)
    shift = bn_shift.astype(jnp.float32)
    b2c = b2.astype(jnp.float32)
    xc = x.astype(cdt)

    # Lane-pad only the *hidden* dim (weights are tiny and DMA'd once, and the
    # intermediate stays lane-dense).  Batch and class dims stay un-padded so
    # x / out keep their natural HBM footprint; Pallas masks the ragged last
    # batch tile automatically.
    h_pad = _round_up(hidden, LANE)
    if h_pad != hidden:
        w1f = jnp.pad(w1f, ((0, 0), (0, h_pad - hidden)))
        shift = jnp.pad(shift, ((0, 0), (0, h_pad - hidden)))
        w2c = jnp.pad(w2c, ((0, h_pad - hidden), (0, 0)))

    # Batch tile: as large as a conservative VMEM budget allows (fewer grid
    # steps, bigger DMAs), but split into >= 2 steps when the batch is big
    # enough so a v7x megacore can shard the "parallel" axis across both TCs.
    itemsize = jnp.dtype(cdt).itemsize
    weight_bytes = ((cin * h_pad + h_pad * num_classes) * itemsize
                    + (h_pad + num_classes) * 4)
    # double-buffered x + out tile per row, plus the f32 intermediate row.
    row_bytes = 2 * (cin + num_classes) * itemsize + h_pad * 4
    budget = 32 << 20
    tm_cap = max(SUBLANE, ((budget - weight_bytes) // row_bytes) // SUBLANE * SUBLANE)
    tm = min(block_m, _round_up(B, SUBLANE), tm_cap)
    if B >= 2 * SUBLANE and pl.cdiv(B, tm) < 2:
        tm = max(SUBLANE, _round_up(pl.cdiv(B, 2), SUBLANE))
    grid = (pl.cdiv(B, tm),)

    vmem_need = weight_bytes + tm * row_bytes
    vmem_limit = int(min(max(4 * vmem_need, 16 << 20), 40 << 20))

    # Weights / shift / bias have constant index_maps -> DMA'd once and kept
    # VMEM-resident; single-buffer them so large heads don't double their VMEM.
    resident = lambda shape: pl.BlockSpec(shape, lambda i: (0, 0),
                                          pipeline_mode=pl.Buffered(1))

    return pl.pallas_call(
        functools.partial(fc_conv_kernel, precision=precision),
        out_shape=jax.ShapeDtypeStruct((B, num_classes), cdt),
        grid=grid,
        in_specs=[
            pl.BlockSpec((tm, cin), lambda i: (i, 0)),   # x tile (pipelined)
            resident((cin, h_pad)),                      # w1 (BN scale folded)
            resident((1, h_pad)),                        # BN shift (f32)
            resident((h_pad, num_classes)),              # w2
            resident((1, num_classes)),                  # bias (f32)
        ],
        out_specs=pl.BlockSpec((tm, num_classes), lambda i: (i, 0)),
        compiler_params=pltpu.CompilerParams(
            dimension_semantics=("parallel",),
            vmem_limit_bytes=vmem_limit,
        ),
    )(xc, w1f, shift, w2c, b2c)


def reference(x, w1, bn_scale, bn_shift, w2, b2):
    h = jnp.maximum(
        jnp.dot(x, w1, precision=lax.Precision.HIGHEST) * bn_scale + bn_shift, 0.0)
    return jnp.dot(h, w2, precision=lax.Precision.HIGHEST) + b2


if __name__ == "__main__":
    # Small shapes consistent with the module:
    #   feature_dim=32, intermediate_channels=64, num_classes=10, num_layers=2
    B, feature_dim, intermediate, num_classes = 2, 32, 64, 10

    key = jax.random.PRNGKey(0)
    k_x, k_w1, k_g, k_b, k_w2, k_b2, k_x2 = jax.random.split(key, 7)

    # Input feature vector (before the unsqueeze to NCHW (B, C, 1, 1)).
    x = jax.random.normal(k_x, (B, feature_dim), dtype=jnp.float32)

    # Hidden 1x1 conv weight: PyTorch shape (intermediate, feature_dim, 1, 1),
    # stored here pre-transposed as (feature_dim, intermediate).
    w1 = jax.random.normal(k_w1, (feature_dim, intermediate), dtype=jnp.float32) * 0.1

    # BatchNorm (eval) folded into per-channel scale/shift.
    eps = 1e-5
    gamma = 1.0 + 0.1 * jax.random.normal(k_g, (intermediate,), dtype=jnp.float32)
    beta = 0.1 * jax.random.normal(k_b, (intermediate,), dtype=jnp.float32)
    running_mean = jnp.zeros((intermediate,), dtype=jnp.float32)
    running_var = jnp.ones((intermediate,), dtype=jnp.float32)
    bn_scale = (gamma / jnp.sqrt(running_var + eps)).reshape(1, intermediate)
    bn_shift = (beta - running_mean * bn_scale[0]).reshape(1, intermediate)

    # Final 1x1 conv: PyTorch shape (num_classes, intermediate, 1, 1) + bias.
    w2 = jax.random.normal(k_w2, (intermediate, num_classes), dtype=jnp.float32) * 0.1
    b2 = (0.1 * jax.random.normal(k_b2, (num_classes,), dtype=jnp.float32)).reshape(
        1, num_classes)

    # --- Test 1: tiny batch, f32, Pallas path forced (min_pallas_batch=0). ---
    out = fc_conv(x, w1, bn_scale, bn_shift, w2, b2, min_pallas_batch=0)
    out = jax.block_until_ready(out)
    ref = reference(x, w1, bn_scale, bn_shift, w2, b2)
    assert out.shape == (B, num_classes)
    assert jnp.allclose(out, ref, atol=1e-5, rtol=1e-5)

    # --- Test 2: multi-tile grid with ragged last tile + bf16 compute path. ---
    B2 = 100  # block_m=32 -> grid=(4,); last tile masks 28 out-of-range rows
    x2 = jax.random.normal(k_x2, (B2, feature_dim), dtype=jnp.float32)
    out2 = fc_conv(x2, w1, bn_scale, bn_shift, w2, b2,
                   block_m=32, compute_dtype=jnp.bfloat16, min_pallas_batch=0)
    out2 = jax.block_until_ready(out2)
    ref2 = reference(x2, w1, bn_scale, bn_shift, w2, b2)
    assert out2.shape == (B2, num_classes)
    assert out2.dtype == jnp.bfloat16
    assert jnp.allclose(out2.astype(jnp.float32), ref2, atol=5e-2, rtol=5e-2)

    print("KERNEL_OK")
</pallas_src>

<mosaic_0001>
module attributes {stable_mosaic.version = 11 : i64} {
  func.func @fc_conv_kernel(%arg0: i32, %arg1: memref<8x32xf32, #tpu.memory_space<vmem>>, %arg2: memref<32x128xf32, #tpu.memory_space<vmem>>, %arg3: memref<1x128xf32, #tpu.memory_space<vmem>>, %arg4: memref<128x10xf32, #tpu.memory_space<vmem>>, %arg5: memref<1x10xf32, #tpu.memory_space<vmem>>, %arg6: memref<8x10xf32, #tpu.memory_space<vmem>>) attributes {dimension_semantics = [#tpu.dimension_semantics<parallel>], iteration_bounds = array<i64: 1>, scalar_prefetch = 0 : i64, scratch_operands = 0 : i64, tpu.core_type = #tpu.core_type<tc>, window_params = [{transform_indices = @transform_0, window_bounds = array<i64: 8, 32>}, {pipeline_mode = #tpu.pipeline_mode<synchronous>, transform_indices = @transform_1, window_bounds = array<i64: 32, 128>}, {pipeline_mode = #tpu.pipeline_mode<synchronous>, transform_indices = @transform_2, window_bounds = array<i64: 1, 128>}, {pipeline_mode = #tpu.pipeline_mode<synchronous>, transform_indices = @transform_3, window_bounds = array<i64: 128, 10>}, {pipeline_mode = #tpu.pipeline_mode<synchronous>, transform_indices = @transform_4, window_bounds = array<i64: 1, 10>}, {transform_indices = @transform_5, window_bounds = array<i64: 8, 10>}]} {
    %c0 = arith.constant 0 : index
    %c0_0 = arith.constant 0 : index
    %0 = vector.load %arg1[%c0, %c0_0] : memref<8x32xf32, #tpu.memory_space<vmem>>, vector<8x32xf32>
    %c0_1 = arith.constant 0 : index
    %c0_2 = arith.constant 0 : index
    %1 = vector.load %arg2[%c0_1, %c0_2] : memref<32x128xf32, #tpu.memory_space<vmem>>, vector<32x128xf32>
    %cst = arith.constant dense<0.000000e+00> : vector<8x128xf32>
    %2 = tpu.matmul %0, %1, %cst {dimension_numbers = #tpu.dot_dimension_numbers<[1], [0], [0], [1], [0, 0, 1, 1], [], []>, precision = #tpu.contract_precision<fp32>} : vector<8x32xf32>, vector<32x128xf32>, vector<8x128xf32> -> vector<8x128xf32>
    %c0_3 = arith.constant 0 : index
    %c0_4 = arith.constant 0 : index
    %3 = vector.load %arg3[%c0_3, %c0_4] : memref<1x128xf32, #tpu.memory_space<vmem>>, vector<1x128xf32>
    %4 = vector.broadcast %3 : vector<1x128xf32> to vector<8x128xf32>
    %5 = arith.addf %2, %4 : vector<8x128xf32>
    %cst_5 = arith.constant 0.000000e+00 : f32
    %6 = vector.broadcast %cst_5 : f32 to vector<8x128xf32>
    %7 = arith.maximumf %5, %6 : vector<8x128xf32>
    %c0_6 = arith.constant 0 : index
    %c0_7 = arith.constant 0 : index
    %8 = vector.load %arg4[%c0_6, %c0_7] : memref<128x10xf32, #tpu.memory_space<vmem>>, vector<128x10xf32>
    %cst_8 = arith.constant dense<0.000000e+00> : vector<8x10xf32>
    %9 = tpu.matmul %7, %8, %cst_8 {dimension_numbers = #tpu.dot_dimension_numbers<[1], [0], [0], [1], [0, 0, 1, 1], [], []>, precision = #tpu.contract_precision<fp32>} : vector<8x128xf32>, vector<128x10xf32>, vector<8x10xf32> -> vector<8x10xf32>
    %c0_9 = arith.constant 0 : index
    %c0_10 = arith.constant 0 : index
    %10 = vector.load %arg5[%c0_9, %c0_10] : memref<1x10xf32, #tpu.memory_space<vmem>>, vector<1x10xf32>
    %11 = vector.broadcast %10 : vector<1x10xf32> to vector<8x10xf32>
    %12 = arith.addf %9, %11 : vector<8x10xf32>
    %c0_11 = arith.constant 0 : index
    %c0_12 = arith.constant 0 : index
    %13 = vector.load %arg6[%c0_11, %c0_12] : memref<8x10xf32, #tpu.memory_space<vmem>>, vector<8x10xf32>
    tpu.vector_store %arg6[%c0_11, %c0_12], %12 {strides = array<i32>} : memref<8x10xf32, #tpu.memory_space<vmem>>, vector<8x10xf32>,
    return
  }
  func.func @transform_0(%arg0: i32) -> (i32, i32) {
    %c0_i32 = arith.constant 0 : i32
    %c0_i32_0 = arith.constant 0 : i32
    return %arg0, %c0_i32 : i32, i32
  }
  func.func @transform_1(%arg0: i32) -> (i32, i32) {
    %c0_i32 = arith.constant 0 : i32
    %c0_i32_0 = arith.constant 0 : i32
    %c0_i32_1 = arith.constant 0 : i32
    return %c0_i32, %c0_i32_0 : i32, i32
  }
  func.func @transform_2(%arg0: i32) -> (i32, i32) {
    %c0_i32 = arith.constant 0 : i32
    %c0_i32_0 = arith.constant 0 : i32
    %c0_i32_1 = arith.constant 0 : i32
    return %c0_i32, %c0_i32_0 : i32, i32
  }
  func.func @transform_3(%arg0: i32) -> (i32, i32) {
    %c0_i32 = arith.constant 0 : i32
    %c0_i32_0 = arith.constant 0 : i32
    %c0_i32_1 = arith.constant 0 : i32
    return %c0_i32, %c0_i32_0 : i32, i32
  }
  func.func @transform_4(%arg0: i32) -> (i32, i32) {
    %c0_i32 = arith.constant 0 : i32
    %c0_i32_0 = arith.constant 0 : i32
    %c0_i32_1 = arith.constant 0 : i32
    return %c0_i32, %c0_i32_0 : i32, i32
  }
  func.func @transform_5(%arg0: i32) -> (i32, i32) {
    %c0_i32 = arith.constant 0 : i32
    %c0_i32_0 = arith.constant 0 : i32
    return %arg0, %c0_i32 : i32, i32
  }
}

</mosaic_0001>

<bundles_post_ra>
// kernel: fc_conv.1
= control target key start
LH: loop header
LB: loop body
LE: loop exit
PB: predicated region body
PF: predicated region fallthrough
CT: control target
= control target key end

     0   :  { %10 = vsyncpa [#allocation3], 0  ;;  %v1846_v2 = vmov 0.0|0.0   ;;  %vm1847_vm0 = vmmov 0   ;;  %v1848_v10 = vmov 0.0   ;;  %vm33_vm1 = vcmask 261120   ;;  %s2363_s0 = inlined_call_operand.vmem [shape: f32[2,32], index: 0, kind: input, shape index: {}]   ;;  %s2364_s1 = inlined_call_operand.vmem [shape: f32[32,128], index: 1, kind: input, shape index: {}]   ;;  %s2365_s2 = inlined_call_operand.vmem [shape: f32[1,128], index: 2, kind: input, shape index: {}]   ;;  %s2366_s3 = inlined_call_operand.vmem [shape: f32[128,10], index: 3, kind: input, shape index: {}]   ;;  %s2367_s4 = inlined_call_operand.vmem [shape: f32[1,10], index: 4, kind: input, shape index: {}]   ;;  %s2368_s5 = inlined_call_operand.hbm [shape: f32[2,10], index: 5, kind: output, shape index: {}]  }
   0x1   :  { %v22_v0 = vld [vmem:[%s2364_s1] sm:$0xff]  ;;  %v23_v1 = vld [vmem:[%s2364_s1 + $0x8] sm:$0xff]  ;;  %1615 = vmatprep.subr.bf16.mxu0 %v1846_v2  ;;  %v24_v5 = vld [vmem:[%s2364_s1 + $0x10] sm:$0xff]  ;;  %1699 = vmatprep.subr.bf16.mxu1 %v1846_v2  ;;  %vm1187_vm2 = vcmask 80896  }
   0x2   :  { %v38_v3 = vand.u32 4294901760, %v22_v0  ;;  %v41_v4 = vand.u32 4294901760, %v23_v1  ;;  %v25_v6 = vld [vmem:[%s2364_s1 + $0x18] sm:$0xff]  ;;  %v21_v7 = vld [vmem:[%s2363_s0] sm:$0xff]  ;;  %v44_v8 = vand.u32 4294901760, %v24_v5  ;;  %1347 = vmatprep.mubr.msk.f32.mxu0 %vm1847_vm0, %v1848_v10  ;;  %1507 = vmatprep.mubr.msk.f32.mxu1 %vm1847_vm0, %v1848_v10  ;;  %v1923_v19 = vld [vmem:[%s2366_s3 + $0x8] sm:$0xff] }
   0x3   :  { %v47_v9 = vand.u32 4294901760, %v25_v6  ;;  %v1904_v11 = vld [vmem:[%s2366_s3] sm:$0xff]  ;;  %v35_v15 = vsel %vm33_vm1, %v21_v7, 0  ;;  %v550_v29 = vand.u32 4294901760, %v1923_v19  ;;  %v1947_v30 = vld [vmem:[%s2366_s3 + $0x10] sm:$0xff]  ;;  %v1970_v38 = vld [vmem:[%s2366_s3 + $0x18] sm:$0xff] }
   0x4   :  { %v1908_v12 = vpack.c.bf16 %v41_v4, %v38_v3  ;;  %v1910_v13 = vsub.f32 %v22_v0, %v38_v3  ;;  %v1912_v14 = vsub.f32 %v23_v1, %v41_v4  ;;  %v1914_v16 = vsub.f32 %v24_v5, %v44_v8  ;;  %v1980_v41 = vld [vmem:[%s2366_s3 + $0x20] sm:$0xff]  ;;  %v1985_v42 = vld [vmem:[%s2366_s3 + $0x28] sm:$0xff]  ;;  %v1992_v47 = vld [vmem:[%s2366_s3 + $0x30] sm:$0xff] }
   0x5   :  { %v1916_v17 = vsub.f32 %v25_v6, %v47_v9  ;;  %v1918_v18 = vand.u32 4294901760, %v35_v15  ;;  %v1926_v20 = vpack.c.bf16 %v47_v9, %v44_v8  ;;  %v547_v23 = vand.u32 4294901760, %v1904_v11  ;;  %v1997_v48 = vld [vmem:[%s2366_s3 + $0x38] sm:$0xff]  ;;  %v2018_v57 = vld [vmem:[%s2366_s3 + $0x40] sm:$0xff]  ;;  %v2035_v61 = vld [vmem:[%s2366_s3 + $0x48] sm:$0xff] }
   0x6   :  { %1617 = vmatpush3.bf16.msra.mxu0 %v1908_v12  ;;  %v119_v21 = vand.u32 4294901760, %v1910_v13  ;;  %v126_v22 = vand.u32 4294901760, %v1912_v14  ;;  %v133_v25 = vand.u32 4294901760, %v1914_v16  ;;  %v1965_v37 = vsub.f32 %v1923_v19, %v550_v29  ;;  %v2060_v6 = vld [vmem:[%s2366_s3 + $0x50] sm:$0xff]  ;;  %v2065_v7 = vld [vmem:[%s2366_s3 + $0x58] sm:$0xff] }
   0x7   :  { %1618 = vmatprep.subr.bf16.mxu0 %v1846_v2  ;;  %v1933_v24 = vsub.f32 %v35_v15, %v1918_v18  ;;  %v140_v26 = vand.u32 4294901760, %v1916_v17  ;;  %v1960_v36 = vsub.f32 %v1904_v11, %v547_v23  ;;  %v553_v40 = vand.u32 4294901760, %v1947_v30 }
   0x8   :  { %v120_v27 = vsub.f32 %v1910_v13, %v119_v21  ;;  %v127_v28 = vsub.f32 %v1912_v14, %v126_v22  ;;  %v134_v32 = vsub.f32 %v1914_v16, %v133_v25  ;;  %v556_v50 = vand.u32 4294901760, %v1970_v38 }
   0x9   :  { %v108_v31 = vand.u32 4294901760, %v1933_v24  ;;  %v141_v33 = vsub.f32 %v1916_v17, %v140_v26  ;;  %v1700_v46 = vpack.c.bf16 %v1965_v37, %v1960_v36  ;;  %v2003_v51 = vsub.f32 %v1947_v30, %v553_v40 }
   0xa   :  { %1620 = vmatpush3.bf16.msra.mxu0 %v1926_v20  ;;  %v121_v34 = vand.u32 4294901760, %v120_v27  ;;  %v128_v35 = vand.u32 4294901760, %v127_v28  ;;  %v135_v44 = vand.u32 4294901760, %v134_v32  ;;  %v559_v52 = vand.u32 4294901760, %v1980_v41 }
   0xb   :  { %v109_v39 = vsub.f32 %v1933_v24, %v108_v31  ;;  %1621 = vmatprep.subr.bf16.mxu0 %v1846_v2  ;;  %v142_v45 = vand.u32 4294901760, %v141_v33  ;;  %1701 = vmatpush3.bf16.msra.mxu1 %v1700_v46  ;;  %v562_v53 = vand.u32 4294901760, %v1985_v42  ;;  %v2011_v54 = vsub.f32 %v1970_v38, %v556_v50 }
   0xc   :  { %v1622_v43 = vpack.c.bf16 %v128_v35, %v121_v34  ;;  %1702 = vmatprep.subr.bf16.mxu1 %v1846_v2  ;;  %v565_v55 = vand.u32 4294901760, %v1992_v47  ;;  %v568_v56 = vand.u32 4294901760, %v1997_v48  ;;  %v2025_v59 = vsub.f32 %v1980_v41, %v559_v52 }
   0xd   :  { %v110_v49 = vand.u32 4294901760, %v109_v39  ;;  %v1625_v58 = vpack.c.bf16 %v142_v45, %v135_v44  ;;  %v2030_v60 = vsub.f32 %v1985_v42, %v562_v53  ;;  %v1703_v62 = vpack.c.bf16 %v2011_v54, %v2003_v51 }
   0xe   :  { %v571_v63 = vand.u32 4294901760, %v2018_v57  ;;  %v2046_v1 = vsub.f32 %v1992_v47, %v565_v55  ;;  %v2051_v3 = vsub.f32 %v1997_v48, %v568_v56  ;;  %v574_v4 = vand.u32 4294901760, %v2035_v61 }
   0xf   :  { %1348 = vmatmul.mubr.f32.vlgmr.msra.gmra.mrb[0].mxu0 %v110_v49  ;;  %1704 = vmatpush3.bf16.msra.mxu1 %v1703_v62  ;;  %v1706_v0 = vpack.c.bf16 %v2030_v60, %v2025_v59  ;;  %v1628_v5 = vpack.c.bf16 %v1912_v14, %v1910_v13  ;;  %v577_v27 = vand.u32 4294901760, %v2060_v6  ;;  %v580_v28 = vand.u32 4294901760, %v2065_v7 }
  0x10   :  { %1623 = vmatpush3.bf16.msra.mxu0 %v1622_v43  ;;  %1358 = vmatprep.mubr.msk.f32.mxu0 %vm1847_vm0, %v1848_v10  ;;  %v2071_v8 = vsub.f32 %v2018_v57, %v571_v63  ;;  %v1709_v9 = vpack.c.bf16 %v2051_v3, %v2046_v1  ;;  %v2079_v15 = vsub.f32 %v2035_v61, %v574_v4 }
  0x11   :  { %1624 = vmatprep.subr.bf16.mxu0 %v1846_v2  ;;  %1705 = vmatprep.subr.bf16.mxu1 %v1846_v2  ;;  %v1631_v32 = vpack.c.bf16 %v1916_v17, %v1914_v16  ;;  %v2094_v34 = vsub.f32 %v2060_v6, %v577_v27  ;;  %v2099_v35 = vsub.f32 %v2065_v7, %v580_v28  ;;  %v535_v17 = vld [vmem:[%s2366_s3 + $0x60] sm:$0xff]  ;;  %v647_v6 = vand.u32 4294901760, %v1965_v37 }
  0x12   :  { %v1712_v33 = vpack.c.bf16 %v2079_v15, %v2071_v8  ;;  %v1640_v43 = vpack.c.bf16 %v126_v22, %v119_v21  ;;  %v1643_v44 = vpack.c.bf16 %v140_v26, %v133_v25  ;;  %v2138_v13 = vpack.c.bf16 %v550_v29, %v547_v23  ;;  %v537_v23 = vld [vmem:[%s2366_s3 + $0x70] sm:$0xff] }
  0x13   :  { %1707 = vmatpush3.bf16.msra.mxu1 %v1706_v0  ;;  %v1715_v39 = vpack.c.bf16 %v2099_v35, %v2094_v34  ;;  %v2157_v11 = vpack.c.bf16 %v562_v53, %v559_v52  ;;  %v2165_v14 = vpack.c.bf16 %v568_v56, %v565_v55  ;;  %v2173_v16 = vpack.c.bf16 %v574_v4, %v571_v63  ;;  %v1205_v4 = vld [vmem:[%s2365_s2] ss:$0 sm:$0xff] }
  0x14   :  { %1626 = vmatpush3.bf16.msra.mxu0 %v1625_v58  ;;  %1708 = vmatprep.subr.bf16.mxu1 %v1846_v2  ;;  %v583_v19 = vand.u32 4294901760, %v535_v17  ;;  %v589_v26 = vand.u32 4294901760, %v537_v23  ;;  %v2194_v30 = vpack.c.bf16 %v580_v28, %v577_v27 }
  0x15   :  { %1627 = vmatprep.subr.bf16.mxu0 %v1846_v2 }
  0x16   :  { %v723_v21 = vsub.f32 %v535_v17, %v583_v19  ;;  %v668_v17 = vand.u32 4294901760, %v2025_v59 }
  0x17   :  { %1359 = vmatmul.mubr.f32.vlgmr.msra.gmra.mrb[0].mxu0 %v1918_v18  ;;  %1710 = vmatpush3.bf16.msra.mxu1 %v1709_v9 }
  0x18   :  { %1629 = vmatpush3.bf16.msra.mxu0 %v1628_v5  ;;  %1369 = vmatprep.mubr.msk.f32.mxu0 %vm1847_vm0, %v1848_v10  ;;  %v724_v45 = vand.u32 4294901760, %v723_v21  ;;  %v640_v5 = vand.u32 4294901760, %v1960_v36 }
  0x19   :  { %1630 = vmatprep.subr.bf16.mxu0 %v1846_v2  ;;  %1711 = vmatprep.subr.bf16.mxu1 %v1846_v2 }
  0x1a   :  { %v725_v47 = vsub.f32 %v723_v21, %v724_v45 }
  0x1b   :  { %1713 = vmatpush3.bf16.msra.mxu1 %v1712_v33  ;;  %v648_v33 = vsub.f32 %v1965_v37, %v647_v6 }
  0x1c   :  { %1632 = vmatpush3.bf16.msra.mxu0 %v1631_v32  ;;  %1714 = vmatprep.subr.bf16.mxu1 %v1846_v2  ;;  %v726_v49 = vand.u32 4294901760, %v725_v47  ;;  %v641_v32 = vsub.f32 %v1960_v36, %v640_v5 }
  0x1d   :  { %1633 = vmatprep.subr.bf16.mxu0 %v1846_v2 }
  0x1f   :  { %1370 = vmatmul.mubr.f32.vlgmr.msra.gmra.mrb[0].mxu0 %v1933_v24  ;;  %1716 = vmatpush3.bf16.msra.mxu1 %v1715_v39  ;;  %v538_v24 = vld [vmem:[%s2366_s3 + $0x78] sm:$0xff]  ;;  %v654_v39 = vand.u32 4294901760, %v2003_v51 }
  0x20   :  { %1635 = vmatpush3.bf16.msra.mxu0 %v1908_v12  ;;  %1380 = vmatprep.mubr.msk.f32.mxu0 %vm1847_vm0, %v1848_v10  ;;  %v592_v29 = vand.u32 4294901760, %v538_v24 }
  0x21   :  { %1636 = vmatprep.subr.bf16.mxu0 %v1846_v2  ;;  %1717 = vmatprep.subr.bf16.mxu1 %v1846_v2 }
  0x22   :  { %v744_v38 = vsub.f32 %v538_v24, %v592_v29  ;;  %v2204_v42 = vpack.c.bf16 %v592_v29, %v589_v26 }
  0x24   :  { %1638 = vmatpush3.bf16.msra.mxu0 %v1926_v20  ;;  %v745_v53 = vand.u32 4294901760, %v744_v38 }
  0x25   :  { %1639 = vmatprep.subr.bf16.mxu0 %v1846_v2 }
  0x26   :  { %v746_v57 = vsub.f32 %v744_v38, %v745_v53 }
  0x27   :  { %1381 = vmatmul.mubr.f32.vlgmr.msra.gmra.mrb[0].mxu0 %v108_v31  ;;  %v737_v31 = vsub.f32 %v537_v23, %v589_v26 }
  0x28   :  { %1641 = vmatpush3.bf16.msra.mxu0 %v1640_v43  ;;  %1391 = vmatprep.mubr.msk.f32.mxu0 %vm1847_vm0, %v1848_v10  ;;  %v747_v61 = vand.u32 4294901760, %v746_v57  ;;  %v661_v43 = vand.u32 4294901760, %v2011_v54  ;;  %v703_v57 = vand.u32 4294901760, %v2079_v15 }
  0x29   :  { %1642 = vmatprep.subr.bf16.mxu0 %v1846_v2  ;;  %v738_v52 = vand.u32 4294901760, %v737_v31 }
  0x2a   :  { %v662_v23 = vsub.f32 %v2011_v54, %v661_v43 }
  0x2b   :  { %v739_v56 = vsub.f32 %v737_v31, %v738_v52  ;;  %v2214_v0 = vpack.c.bf16 %v745_v53, %v738_v52 }
  0x2c   :  { %1644 = vmatpush3.bf16.msra.mxu0 %v1643_v44 }
  0x2d   :  { %1645 = vmatprep.subr.bf16.mxu0 %v1846_v2  ;;  %v740_v58 = vand.u32 4294901760, %v739_v56  ;;  %v696_v56 = vand.u32 4294901760, %v2071_v8 }
  0x2f   :  { %1392 = vmatmul.mubr.f32.vlgmr.msra.gmra.mrb[0].mxu0 %v1918_v18  ;;  %v2210_v62 = vpack.c.bf16 %v747_v61, %v740_v58 }
  0x30   :  { %1647 = vmatpush3.bf16.msra.mxu0 %v1908_v12  ;;  %1402 = vmatprep.mubr.msk.f32.mxu0 %vm1847_vm0, %v1848_v10  ;;  %v2147_v12 = vpack.c.bf16 %v556_v50, %v553_v40  ;;  %v1721_v40 = vpack.c.bf16 %v744_v38, %v737_v31  ;;  %v682_v31 = vand.u32 4294901760, %v2046_v1  ;;  %v689_v38 = vand.u32 4294901760, %v2051_v3 }
  0x31   :  { %1648 = vmatprep.subr.bf16.mxu0 %v1846_v2 }
  0x32   :  { %v690_v52 = vsub.f32 %v2051_v3, %v689_v38  ;;  %v1757_v37 = vpack.c.bf16 %v689_v38, %v682_v31 }
  0x34   :  { %1650 = vmatpush3.bf16.msra.mxu0 %v1926_v20 }
  0x35   :  { %1651 = vmatprep.subr.bf16.mxu0 %v1846_v2 }
  0x37   :  { %1403 = vmatmul.mubr.f32.vlgmr.msra.gmra.mrb[0].mxu0 %v1918_v18  ;;  %v536_v18 = vld [vmem:[%s2366_s3 + $0x68] sm:$0xff] }
  0x38   :  { %1653 = vmatpush3.bf16.msra.mxu0 %v2138_v13  ;;  %1437 = vmatprep.mubr.msk.f32.mxu0 %vm1847_vm0, %v1848_v10  ;;  %v586_v20 = vand.u32 4294901760, %v536_v18 }
  0x39   :  { %1654 = vmatprep.subr.bf16.mxu0 %v1846_v2 }
  0x3a   :  { %v730_v22 = vsub.f32 %v536_v18, %v586_v20  ;;  %v2199_v41 = vpack.c.bf16 %v586_v20, %v583_v19  ;;  %v675_v19 = vand.u32 4294901760, %v2030_v60  ;;  %v642_v20 = vand.u32 4294901760, %v641_v32 }
  0x3c   :  { %1656 = vmatpush3.bf16.msra.mxu0 %v2147_v12  ;;  %v1718_v25 = vpack.c.bf16 %v730_v22, %v723_v21  ;;  %v731_v46 = vand.u32 4294901760, %v730_v22  ;;  %v649_v21 = vand.u32 4294901760, %v648_v33  ;;  %v676_v29 = vsub.f32 %v2030_v60, %v675_v19  ;;  %v1206_v60 = vld [vmem:[%s2367_s4] ss:$0 sm:$0xff] }
  0x3d   :  { %1657 = vmatprep.subr.bf16.mxu0 %v1846_v2  ;;  %v1754_v36 = vpack.c.bf16 %v675_v19, %v668_v17 }
  0x3e   :  { %1719 = vmatpush3.bf16.msra.mxu1 %v1718_v25  ;;  %v732_v48 = vsub.f32 %v730_v22, %v731_v46  ;;  %v2212_v63 = vpack.c.bf16 %v731_v46, %v724_v45  ;;  %v655_v22 = vsub.f32 %v2003_v51, %v654_v39  ;;  %v669_v25 = vsub.f32 %v2025_v59, %v668_v17 }
  0x3f   :  { %1720 = vmatprep.subr.bf16.mxu1 %v1846_v2  ;;  %v663_v46 = vand.u32 4294901760, %v662_v23  ;;  %v1760_v51 = vpack.c.bf16 %v703_v57, %v696_v56 }
  0x40   :  { %1659 = vmatpush3.bf16.msra.mxu0 %v2157_v11  ;;  %v733_v50 = vand.u32 4294901760, %v732_v48  ;;  %v656_v45 = vand.u32 4294901760, %v655_v22  ;;  %v670_v48 = vand.u32 4294901760, %v669_v25  ;;  %v1751_v25 = vpack.c.bf16 %v661_v43, %v654_v39 }
  0x41   :  { %1660 = vmatprep.subr.bf16.mxu0 %v1846_v2 }
  0x42   :  { %1722 = vmatpush3.bf16.msra.mxu1 %v1721_v40  ;;  %v2208_v55 = vpack.c.bf16 %v733_v50, %v726_v49  ;;  %v1676_v40 = vpack.c.bf16 %v649_v21, %v642_v20  ;;  %v677_v49 = vand.u32 4294901760, %v676_v29  ;;  %v683_v50 = vsub.f32 %v2046_v1, %v682_v31 }
  0x43   :  { %1723 = vmatprep.subr.bf16.mxu1 %v1846_v2  ;;  %v1679_v53 = vpack.c.bf16 %v663_v46, %v656_v45 }
  0x44   :  { %1662 = vmatpush3.bf16.msra.mxu0 %v2165_v14  ;;  %v1682_v58 = vpack.c.bf16 %v677_v49, %v670_v48  ;;  %v684_v61 = vand.u32 4294901760, %v683_v50 }
  0x45   :  { %1663 = vmatprep.subr.bf16.mxu0 %v1846_v2 }
  0x48   :  { %1665 = vmatpush3.bf16.msra.mxu0 %v2173_v16 }
  0x49   :  { %1666 = vmatprep.subr.bf16.mxu0 %v1846_v2 }
  0x4c   :  { %1668 = vmatpush3.bf16.msra.mxu0 %v2194_v30 }
  0x4d   :  { %1669 = vmatprep.subr.bf16.mxu0 %v1846_v2 }
  0x50   :  { %1671 = vmatpush3.bf16.msra.mxu0 %v2199_v41 }
  0x51   :  { %1672 = vmatprep.subr.bf16.mxu0 %v1846_v2 }
  0x54   :  { %1674 = vmatpush3.bf16.msra.mxu0 %v2204_v42 }
  0x55   :  { %1675 = vmatprep.subr.bf16.mxu0 %v1846_v2 }
 0x10a   :  { %v518_v7 = vpop.f32.mrb[0].mxu0 }
 0x10b   :  { %v1795_v9 = vadd.f32 %v1205_v4, %v518_v7  ;;  %v1404_v27 = vpop.f32.mrb[1].mxu0  ;;  %v691_v4 = vand.u32 4294901760, %v690_v52  ;;  %v697_v7 = vsub.f32 %v2071_v8, %v696_v56 }
 0x10c   :  { %v710_v27 = vand.u32 4294901760, %v2094_v34 }
 0x10d   :  { %v522_v28 = vmax.f32 %v1795_v9, 0.0  ;;  %v704_v9 = vsub.f32 %v2079_v15, %v703_v57  ;;  %v1685_v32 = vpack.c.bf16 %v691_v4, %v684_v61  ;;  %v698_v33 = vand.u32 4294901760, %v697_v7 }
 0x10e   :  { %v711_v21 = vsub.f32 %v2094_v34, %v710_v27 }
 0x10f   :  { %v2229_v44 = vand.u32 4294901760, %v522_v28  ;;  %v705_v20 = vand.u32 4294901760, %v704_v9 }
 0x110   :  { %v712_v22 = vand.u32 4294901760, %v711_v21 }
 0x111   :  { %v2233_v18 = vsub.f32 %v522_v28, %v2229_v44  ;;  %v717_v28 = vand.u32 4294901760, %v2099_v35  ;;  %v1688_v15 = vpack.c.bf16 %v705_v20, %v698_v33 }
 0x113   :  { %v629_v24 = vand.u32 4294901760, %v2233_v18  ;;  %1508 = vmatmul.mubr.f32.vlgmr.msra.gmra.mrb[0].mxu1 %v2233_v18  ;;  %v718_v8 = vsub.f32 %v2099_v35, %v717_v28  ;;  %v1748_v35 = vpack.c.bf16 %v647_v6, %v640_v5  ;;  %v1763_v54 = vpack.c.bf16 %v717_v28, %v710_v27 }
 0x114   :  { %1725 = vmatpush3.bf16.msra.mxu1 %v2138_v13  ;;  %1542 = vmatprep.mubr.msk.f32.mxu1 %vm1847_vm0, %v1848_v10 }
 0x115   :  { %v630_v26 = vsub.f32 %v2233_v18, %v629_v24  ;;  %1726 = vmatprep.subr.bf16.mxu1 %v1846_v2  ;;  %v719_v23 = vand.u32 4294901760, %v718_v8 }
 0x117   :  { %v631_v47 = vand.u32 4294901760, %v630_v26  ;;  %v1691_v34 = vpack.c.bf16 %v719_v23, %v712_v22 }
 0x118   :  { %1728 = vmatpush3.bf16.msra.mxu1 %v2147_v12 }
 0x119   :  { %1438 = vmatmul.mubr.f32.vlgmr.msra.gmra.mrb[2].mxu0 %v631_v47  ;;  %1729 = vmatprep.subr.bf16.mxu1 %v1846_v2 }
 0x11a   :  { %1677 = vmatpush3.bf16.msra.mxu0 %v1676_v40  ;;  %1472 = vmatprep.mubr.msk.f32.mxu0 %vm1847_vm0, %v1848_v10 }
 0x11b   :  { %1678 = vmatprep.subr.bf16.mxu0 %v1846_v2 }
 0x11c   :  { %1731 = vmatpush3.bf16.msra.mxu1 %v2157_v11 }
 0x11d   :  { %1732 = vmatprep.subr.bf16.mxu1 %v1846_v2 }
 0x11e   :  { %1680 = vmatpush3.bf16.msra.mxu0 %v1679_v53 }
 0x11f   :  { %1681 = vmatprep.subr.bf16.mxu0 %v1846_v2 }
 0x120   :  { %1734 = vmatpush3.bf16.msra.mxu1 %v2165_v14 }
 0x121   :  { %1735 = vmatprep.subr.bf16.mxu1 %v1846_v2 }
 0x122   :  { %1683 = vmatpush3.bf16.msra.mxu0 %v1682_v58 }
 0x123   :  { %1684 = vmatprep.subr.bf16.mxu0 %v1846_v2 }
 0x124   :  { %1737 = vmatpush3.bf16.msra.mxu1 %v2173_v16 }
 0x125   :  { %1738 = vmatprep.subr.bf16.mxu1 %v1846_v2 }
 0x126   :  { %1686 = vmatpush3.bf16.msra.mxu0 %v1685_v32 }
 0x127   :  { %1687 = vmatprep.subr.bf16.mxu0 %v1846_v2 }
 0x128   :  { %1740 = vmatpush3.bf16.msra.mxu1 %v2194_v30 }
 0x129   :  { %1741 = vmatprep.subr.bf16.mxu1 %v1846_v2 }
 0x12a   :  { %1689 = vmatpush3.bf16.msra.mxu0 %v1688_v15 }
 0x12b   :  { %1690 = vmatprep.subr.bf16.mxu0 %v1846_v2 }
 0x12c   :  { %1743 = vmatpush3.bf16.msra.mxu1 %v2199_v41 }
 0x12d   :  { %1744 = vmatprep.subr.bf16.mxu1 %v1846_v2 }
 0x12e   :  { %1692 = vmatpush3.bf16.msra.mxu0 %v1691_v34 }
 0x12f   :  { %1693 = vmatprep.subr.bf16.mxu0 %v1846_v2 }
 0x130   :  { %1746 = vmatpush3.bf16.msra.mxu1 %v2204_v42 }
 0x131   :  { %1747 = vmatprep.subr.bf16.mxu1 %v1846_v2 }
 0x132   :  { %1695 = vmatpush3.bf16.msra.mxu0 %v2208_v55 }
 0x133   :  { %1543 = vmatmul.mubr.f32.vlgmr.msra.gmra.mrb[0].mxu1 %v629_v24  ;;  %1696 = vmatprep.subr.bf16.mxu0 %v1846_v2 }
 0x134   :  { %1749 = vmatpush3.bf16.msra.mxu1 %v1748_v35  ;;  %1577 = vmatprep.mubr.msk.f32.mxu1 %vm1847_vm0, %v1848_v10 }
 0x135   :  { %1750 = vmatprep.subr.bf16.mxu1 %v1846_v2 }
 0x136   :  { %1698 = vmatpush3.bf16.msra.mxu0 %v2210_v62 }
 0x138   :  { %1752 = vmatpush3.bf16.msra.mxu1 %v1751_v25 }
 0x139   :  { %1473 = vmatmul.mubr.f32.vlgmr.msra.gmra.mrb[2].mxu0 %v2229_v44  ;;  %1753 = vmatprep.subr.bf16.mxu1 %v1846_v2 }
 0x13c   :  { %1755 = vmatpush3.bf16.msra.mxu1 %v1754_v36 }
 0x13d   :  { %1756 = vmatprep.subr.bf16.mxu1 %v1846_v2 }
 0x140   :  { %1758 = vmatpush3.bf16.msra.mxu1 %v1757_v37 }
 0x141   :  { %1759 = vmatprep.subr.bf16.mxu1 %v1846_v2 }
 0x144   :  { %1761 = vmatpush3.bf16.msra.mxu1 %v1760_v51 }
 0x145   :  { %1762 = vmatprep.subr.bf16.mxu1 %v1846_v2 }
 0x148   :  { %1764 = vmatpush3.bf16.msra.mxu1 %v1763_v54 }
 0x149   :  { %1765 = vmatprep.subr.bf16.mxu1 %v1846_v2 }
 0x14c   :  { %1767 = vmatpush3.bf16.msra.mxu1 %v2212_v63 }
 0x14d   :  { %1768 = vmatprep.subr.bf16.mxu1 %v1846_v2 }
 0x150   :  { %1770 = vmatpush3.bf16.msra.mxu1 %v2214_v0 }
 0x151   :  { %1771 = vmatprep.subr.bf16.mxu1 %v1846_v2 }
 0x153   :  { %1578 = vmatmul.mubr.f32.vlgmr.msra.gmra.mrb[0].mxu1 %v2229_v44 }
 0x154   :  { %1773 = vmatpush3.bf16.msra.mxu1 %v2138_v13  ;;  %1612 = vmatprep.mubr.msk.f32.mxu1 %vm1847_vm0, %v1848_v10 }
 0x155   :  { %1774 = vmatprep.subr.bf16.mxu1 %v1846_v2 }
 0x158   :  { %1776 = vmatpush3.bf16.msra.mxu1 %v2147_v12 }
 0x159   :  { %1777 = vmatprep.subr.bf16.mxu1 %v1846_v2 }
 0x15c   :  { %1779 = vmatpush3.bf16.msra.mxu1 %v2157_v11 }
 0x15d   :  { %1780 = vmatprep.subr.bf16.mxu1 %v1846_v2 }
 0x160   :  { %1782 = vmatpush3.bf16.msra.mxu1 %v2165_v14 }
 0x161   :  { %1783 = vmatprep.subr.bf16.mxu1 %v1846_v2 }
 0x164   :  { %1785 = vmatpush3.bf16.msra.mxu1 %v2173_v16 }
 0x165   :  { %1786 = vmatprep.subr.bf16.mxu1 %v1846_v2 }
 0x168   :  { %1788 = vmatpush3.bf16.msra.mxu1 %v2194_v30 }
 0x169   :  { %1789 = vmatprep.subr.bf16.mxu1 %v1846_v2 }
 0x16c   :  { %1791 = vmatpush3.bf16.msra.mxu1 %v2199_v41 }
 0x16d   :  { %1792 = vmatprep.subr.bf16.mxu1 %v1846_v2 }
 0x170   :  { %1794 = vmatpush3.bf16.msra.mxu1 %v2204_v42 }
 0x173   :  { %1613 = vmatmul.mubr.f32.vlgmr.msra.gmra.mrb[0].mxu1 %v2229_v44 }
 0x20c   :  { %v784_v10 = vpop.f32.mrb[2].mxu0 }
 0x20d   :  { %v1474_v59 = vpop.f32.mrb[3].mxu0  ;;  %v1796_v1 = vadd.f32 %v1206_v60, %v784_v10 }
 0x246   :  { %v1183_v3 = vpop.f32.mrb[0].mxu1 }
 0x247   :  { %v1797_v13 = vadd.f32 %v1796_v1, %v1183_v3  ;;  %v1614_v12 = vpop.f32.mrb[1].mxu1 }
 0x249   :  { %1188 = vst.msk [vmem:[#allocation2] sm:$0xff] %vm1187_vm2, %v1797_v13 }
 0x24a   :  { %1193 = vsyncadd [#allocation3], 96  ;;  %s1849_s8 = smov [#allocation2]  }
 0x24b   :  { %s1194_s9 = sshll.u32 %s1849_s8, 4  ;;  %s1195_s9 = int_to_ptr.vmem [resolvable:$true] %s1194_s9 }
 0x24c   :  { %s1822_s10 = scalar_lea.vmem %s1195_s9, 32  ;;  %s1826_s11 = scalar_lea.vmem %s1195_s9, 128 }
 0x24d   :  { %p1823_p0 = scmp.ne.s32.totalorder %s1195_s9, %s1822_s10  ;;  %p1827_p1 = scmp.lt.s32.totalorder %s1195_s9, %s1195_s9 }
 0x24e   :  { %p1828_p2 = scmp.lt.s32.totalorder %s1826_s11, %s1822_s10 }
 0x250   :  { %p1829_p3 = por %p1828_p2, %p1827_p1 }
 0x252   :  { %p1830_p4 = pnand %p1829_p3, %p1823_p0 }
 0x254   :  { %1833 = shalt.err (!%p1830_p4)
}
 0x255   :  { %s1834_s13 = scalar_lea.hbm %s2368_s5, 32 }
 0x256   :  { %p1835_p5 = scmp.ne.s32.totalorder %s2368_s5, %s1834_s13  ;;  %p1838_p6 = scmp.lt.u32.totalorder %s1834_s13, %s2368_s5 }
 0x258   :  { %p1840_p7 = pnand %p1838_p6, %p1835_p5 }
 0x25a   :  { %1843 = shalt.err (!%p1840_p7)
}
 0x25b   :  { %s1850_s18 = smov 32   ;;  %s1851_s19 = smov 2  }
 0x25c   :  { %1200 = dma.vmem_to_hbm [thread:$0]  %s1195_s9, 32, %s2368_s5, [#allocation3], %s1850_s18, %s1850_s18, %s1851_s19  }
 0x25d   :  { %1844 = dma.done.wait [#allocation3], 128  }
 0x25e   :  { %1845 = vsyncadd [#allocation3], 4294967168 }
 0x25f   :  { %1204 = vsyncpa [#allocation3], 1 }

</bundles_post_ra>
